<compile_context>
chip_gen: v7x
topology: tpu7x:2x2x1
jax: 0.10.0
libtpu: 0.0.40
codegen_flags: <defaults>
</compile_context>

<pallas_src>
import functools

import jax
import jax.numpy as jnp
from jax import lax
from jax.experimental import pallas as pl
from jax.experimental.pallas import tpu as pltpu

LANE = 128
SUBLANE = 8
# 4096 rows x 128 lanes x 4 B = 2 MiB per f32 input block; 2 inputs x 2 pipeline buffers
# = 8 MiB of block VMEM, plus elementwise temps.  Even with zero temp-buffer reuse this
# stays under the 48 MiB scoped limit below (v7x physical VMEM is 64 MiB/core).
# TODO(synk): sweep 4096 vs 8192 on real hardware; 8192 needs Mosaic temp reuse to fit v7x.
BLOCK_ROWS_TARGET = 4096
VMEM_LIMIT_BYTES = 48 * 1024 * 1024
NCORES_TARGET = 2  # v7x has 2 TensorCores/chip; a size-2 parallel axis is ~free on 1-TC chips.


def _bce_with_logits(x, t):
    # Fused BCE-with-logits matching torch.binary_cross_entropy(sigmoid(x), t):
    #   -log(sigmoid(x)) = softplus(-x),  -log(1 - sigmoid(x)) = softplus(x)
    # torch clamps each log term at -100, so clamp each softplus term at 100.
    # 2 EUP transcendentals per element (exp + log1p); the rest is VPU filler.
    sp_pos = jnp.maximum(x, 0.0) + jnp.log1p(jnp.exp(-jnp.abs(x)))  # softplus(x)
    sp_neg = sp_pos - x                                             # softplus(-x)
    return t * jnp.minimum(sp_neg, 100.0) + (1.0 - t) * jnp.minimum(sp_pos, 100.0)


def _focal_partial_kernel(x_ref, t_ref, out_ref, *,
                          block_rows, blocks_per_core, num_valid_blocks,
                          n_valid, needs_mask, has_overhang):
    c = pl.program_id(0)              # TensorCore (parallel) axis
    i = pl.program_id(1)              # streaming (reduction / "arbitrary") axis
    gb = c * blocks_per_core + i      # global block index
    last = num_valid_blocks - 1       # static Python int

    @pl.when(i == 0)
    def _():
        out_ref[...] = jnp.zeros_like(out_ref)

    def accumulate(mask_tail):
        x = x_ref[...].astype(jnp.float32)
        t = t_ref[...].astype(jnp.float32)
        bce = _bce_with_logits(x, t)
        if mask_tail:
            # Zero wrapper padding, Pallas' ragged-last-block padding, and the stale
            # (un-DMA'd) VMEM tail.  Keep jnp.where (a select), NOT a multiplicative
            # mask: the stale tail may hold NaN/Inf.
            # NOTE: int32 gidx overflows only for n >= 2^31 elements (unrealistic here).
            base = last * block_rows * LANE          # static: only the last block is masked
            row = lax.broadcasted_iota(jnp.int32, (block_rows, LANE), 0)
            lane = lax.broadcasted_iota(jnp.int32, (block_rows, LANE), 1)
            gidx = base + row * LANE + lane
            bce = jnp.where(gidx < n_valid, bce, 0.0)
        # VPU-only fold onto the resident (8,128) output block; the single cross-lane
        # reduce happens outside the kernel on the tiny (ncores,8,128) partials.
        r8 = (block_rows // SUBLANE) * SUBLANE       # static
        if r8:
            out_ref[0] += jnp.sum(
                bce[:r8].reshape(r8 // SUBLANE, SUBLANE, LANE), axis=0)
        rem = block_rows - r8                        # static; nonzero only when a small
        if rem:                                      # input fits in a single short block
            out_ref[0, :rem, :] += bce[r8:, :]

    if needs_mask or has_overhang:
        # Only the last valid block needs masking; overhang blocks (from rounding the
        # block count up to a multiple of ncores) are skipped entirely.
        @pl.when(gb < last)
        def _():
            accumulate(False)

        @pl.when(gb == last)
        def _():
            accumulate(needs_mask)
    else:
        accumulate(False)


def focal_loss(inputs, targets, alpha=0.8, gamma=2, smooth=1,
               block_rows_target=BLOCK_ROWS_TARGET):
    # `smooth` is unused, matching the reference PyTorch forward.
    # Inputs may be f32 or bf16 (targets additionally int8/bool-like): the kernel
    # upcasts in-VMEM, so narrower HBM dtypes directly halve bytes moved.
    x = inputs.reshape(-1)
    t = targets.reshape(-1)
    n = x.shape[0]

    # Pad only to a lane multiple (128); the (8,128) rule constrains block_shape, not
    # the array, so lane-aligned inputs need no padded HBM copy at all.
    pad = (-n) % LANE
    if pad:
        x = jnp.pad(x, (0, pad))
        t = jnp.pad(t, (0, pad))
    rows = (n + pad) // LANE

    block_rows = rows if rows <= block_rows_target else block_rows_target
    num_blocks = pl.cdiv(rows, block_rows)
    ncores = NCORES_TARGET if num_blocks >= 2 else 1
    blocks_per_core = pl.cdiv(num_blocks, ncores)
    has_overhang = (ncores * blocks_per_core) != num_blocks
    needs_mask = (num_blocks * block_rows * LANE) != n

    x2 = x.reshape(rows, LANE)   # reshape of a contiguous flat array: free
    t2 = t.reshape(rows, LANE)

    def in_map(c, i):
        # Clamp so the (skipped) overhang grid steps never DMA out of bounds.
        return (jnp.minimum(c * blocks_per_core + i, num_blocks - 1), 0)

    blk = pl.BlockSpec((block_rows, LANE), in_map)
    kernel = functools.partial(
        _focal_partial_kernel,
        block_rows=block_rows, blocks_per_core=blocks_per_core,
        num_valid_blocks=num_blocks, n_valid=n,
        needs_mask=needs_mask, has_overhang=has_overhang)

    partials = pl.pallas_call(
        kernel,
        out_shape=jax.ShapeDtypeStruct((ncores, SUBLANE, LANE), jnp.float32),
        grid_spec=pltpu.PrefetchScalarGridSpec(
            num_scalar_prefetch=0,
            grid=(ncores, blocks_per_core),
            in_specs=[blk, blk],
            out_specs=pl.BlockSpec((1, SUBLANE, LANE), lambda c, i: (c, 0, 0)),
        ),
        compiler_params=pltpu.CompilerParams(
            dimension_semantics=("parallel", "arbitrary"),
            vmem_limit_bytes=VMEM_LIMIT_BYTES),
    )(x2, t2)

    # Tiny scalar epilogue: combine per-core partials, mean, focal transform.
    bce_mean = jnp.sum(partials) * (1.0 / n)
    bce_exp = jnp.exp(-bce_mean)
    one_m = 1.0 - bce_exp
    if isinstance(gamma, int):
        pw = lax.integer_pow(one_m, gamma)
    else:
        pw = one_m ** gamma
    return alpha * pw * bce_mean


def _reference(inputs, targets, alpha=0.8, gamma=2):
    # Matches PyTorch: sigmoid -> binary_cross_entropy (log clamped at -100) -> focal.
    p = jax.nn.sigmoid(inputs.reshape(-1).astype(jnp.float32))
    t = targets.reshape(-1).astype(jnp.float32)
    bce = jnp.mean(-(t * jnp.maximum(jnp.log(p), -100.0)
                     + (1.0 - t) * jnp.maximum(jnp.log1p(-p), -100.0)))
    return alpha * (1.0 - jnp.exp(-bce)) ** gamma * bce


if __name__ == "__main__":
    key = jax.random.PRNGKey(0)
    k1, k2, k3, k4, k5, k6 = jax.random.split(key, 6)

    # 1) Segmentation-style NCHW shape: (2, 4, 16, 16) -> 2048 elems (lane-aligned path).
    x = jax.random.normal(k1, (2, 4, 16, 16), dtype=jnp.float32)
    tgt = (jax.random.uniform(k2, (2, 4, 16, 16)) > 0.5).astype(jnp.float32)
    loss = jax.block_until_ready(focal_loss(x, tgt))
    ref = _reference(x, tgt)
    assert jnp.allclose(loss, ref, atol=1e-5, rtol=1e-5), (loss, ref)

    # 2) Odd-sized input (1155 elems): exercises wrapper pad + masked / short-block path.
    x_odd = jax.random.normal(k3, (3, 5, 7, 11), dtype=jnp.float32)
    t_odd = (jax.random.uniform(k4, (3, 5, 7, 11)) > 0.5).astype(jnp.float32)
    loss_odd = jax.block_until_ready(focal_loss(x_odd, t_odd))
    ref_odd = _reference(x_odd, t_odd)
    assert jnp.allclose(loss_odd, ref_odd, atol=1e-5, rtol=1e-5), (loss_odd, ref_odd)

    # 3) Multi-block path with a small block override: exercises the 2-way "parallel"
    #    core split, overhang-block skip, ragged last block and tail mask.
    x_mb = jax.random.normal(k5, (2, 9, 500), dtype=jnp.float32)   # 9000 elems
    t_mb = (jax.random.uniform(k6, (2, 9, 500)) > 0.5).astype(jnp.float32)
    loss_mb = jax.block_until_ready(focal_loss(x_mb, t_mb, block_rows_target=8))
    ref_mb = _reference(x_mb, t_mb)
    assert jnp.allclose(loss_mb, ref_mb, atol=1e-5, rtol=1e-5), (loss_mb, ref_mb)

    # 4) bf16 inputs (halved HBM traffic path); reference computed from the same values.
    x_bf = x.astype(jnp.bfloat16)
    t_bf = tgt.astype(jnp.bfloat16)
    loss_bf = jax.block_until_ready(focal_loss(x_bf, t_bf))
    ref_bf = _reference(x_bf.astype(jnp.float32), t_bf.astype(jnp.float32))
    assert jnp.allclose(loss_bf, ref_bf, atol=1e-5, rtol=1e-5), (loss_bf, ref_bf)

    print("KERNEL_OK")
</pallas_src>

<mosaic_0001>
module attributes {stable_mosaic.version = 11 : i64} {
  func.func @_focal_partial_kernel(%arg0: i32, %arg1: i32, %arg2: memref<16x128xf32, #tpu.memory_space<vmem>>, %arg3: memref<16x128xf32, #tpu.memory_space<vmem>>, %arg4: memref<1x8x128xf32, #tpu.memory_space<vmem>>) attributes {dimension_semantics = [#tpu.dimension_semantics<parallel>, #tpu.dimension_semantics<arbitrary>], iteration_bounds = array<i64: 1, 1>, scalar_prefetch = 0 : i64, scratch_operands = 0 : i64, tpu.core_type = #tpu.core_type<tc>, window_params = [{transform_indices = @transform_0, window_bounds = array<i64: 16, 128>}, {transform_indices = @transform_1, window_bounds = array<i64: 16, 128>}, {transform_indices = @transform_2, window_bounds = array<i64: 1, 8, 128>}]} {
    %c0_i32 = arith.constant 0 : i32
    %0 = arith.cmpi eq, %arg1, %c0_i32 : i32
    %1 = arith.extui %0 : i1 to i32
    %c0_i32_0 = arith.constant 0 : i32
    %2 = arith.cmpi ne, %1, %c0_i32_0 : i32
    scf.if %2 {
      %cst_15 = arith.constant 0.000000e+00 : f32
      %31 = vector.broadcast %cst_15 : f32 to vector<1x8x128xf32>
      %c0_16 = arith.constant 0 : index
      %c0_17 = arith.constant 0 : index
      %c0_18 = arith.constant 0 : index
      %32 = vector.load %arg4[%c0_16, %c0_17, %c0_18] : memref<1x8x128xf32, #tpu.memory_space<vmem>>, vector<1x8x128xf32>
      tpu.vector_store %arg4[%c0_16, %c0_17, %c0_18], %31 {strides = array<i32>} : memref<1x8x128xf32, #tpu.memory_space<vmem>>, vector<1x8x128xf32>,
    } else {
    }
    %c0 = arith.constant 0 : index
    %c0_1 = arith.constant 0 : index
    %3 = vector.load %arg2[%c0, %c0_1] : memref<16x128xf32, #tpu.memory_space<vmem>>, vector<16x128xf32>
    %c0_2 = arith.constant 0 : index
    %c0_3 = arith.constant 0 : index
    %4 = vector.load %arg3[%c0_2, %c0_3] : memref<16x128xf32, #tpu.memory_space<vmem>>, vector<16x128xf32>
    %cst = arith.constant 0.000000e+00 : f32
    %5 = vector.broadcast %cst : f32 to vector<16x128xf32>
    %6 = arith.maximumf %3, %5 : vector<16x128xf32>
    %7 = math.absf %3 : vector<16x128xf32>
    %cst_4 = arith.constant 0.000000e+00 : f32
    %8 = vector.broadcast %cst_4 : f32 to vector<16x128xf32>
    %9 = arith.subf %8, %7 : vector<16x128xf32>
    %10 = math.exp %9 : vector<16x128xf32>
    %11 = math.log1p %10 : vector<16x128xf32>
    %12 = arith.addf %6, %11 : vector<16x128xf32>
    %13 = arith.subf %12, %3 : vector<16x128xf32>
    %cst_5 = arith.constant 1.000000e+02 : f32
    %14 = vector.broadcast %cst_5 : f32 to vector<16x128xf32>
    %15 = arith.minimumf %13, %14 : vector<16x128xf32>
    %16 = arith.mulf %4, %15 : vector<16x128xf32>
    %cst_6 = arith.constant 1.000000e+00 : f32
    %17 = vector.broadcast %cst_6 : f32 to vector<16x128xf32>
    %18 = arith.subf %17, %4 : vector<16x128xf32>
    %cst_7 = arith.constant 1.000000e+02 : f32
    %19 = vector.broadcast %cst_7 : f32 to vector<16x128xf32>
    %20 = arith.minimumf %12, %19 : vector<16x128xf32>
    %21 = arith.mulf %18, %20 : vector<16x128xf32>
    %22 = arith.addf %16, %21 : vector<16x128xf32>
    %c0_8 = arith.constant 0 : index
    %c0_9 = arith.constant 0 : index
    %c0_10 = arith.constant 0 : index
    %23 = vector.load %arg4[%c0_8, %c0_9, %c0_10] : memref<1x8x128xf32, #tpu.memory_space<vmem>>, vector<1x8x128xf32>
    %24 = vector.shape_cast %23 : vector<1x8x128xf32> to vector<8x128xf32>
    %25 = vector.shape_cast %22 : vector<16x128xf32> to vector<2x8x128xf32>
    %cst_11 = arith.constant dense<0.000000e+00> : vector<8x128xf32>
    %26 = vector.multi_reduction <add>, %25, %cst_11 [0] : vector<2x8x128xf32> to vector<8x128xf32>
    %27 = arith.addf %24, %26 : vector<8x128xf32>
    %c0_12 = arith.constant 0 : index
    %c0_13 = arith.constant 0 : index
    %c0_14 = arith.constant 0 : index
    %28 = vector.load %arg4[%c0_12, %c0_13, %c0_14] : memref<1x8x128xf32, #tpu.memory_space<vmem>>, vector<1x8x128xf32>
    %29 = vector.shape_cast %28 : vector<1x8x128xf32> to vector<8x128xf32>
    %30 = vector.shape_cast %27 : vector<8x128xf32> to vector<1x8x128xf32>
    tpu.vector_store %arg4[%c0_12, %c0_13, %c0_14], %30 {strides = array<i32>} : memref<1x8x128xf32, #tpu.memory_space<vmem>>, vector<1x8x128xf32>,
    return
  }
  func.func @transform_0(%arg0: i32, %arg1: i32) -> (i32, i32) {
    %c1_i32 = arith.constant 1 : i32
    %0 = arith.muli %arg0, %c1_i32 : i32
    %1 = arith.addi %0, %arg1 : i32
    %c0_i32 = arith.constant 0 : i32
    %2 = arith.minsi %1, %c0_i32 : i32
    %c0_i32_0 = arith.constant 0 : i32
    %c0_i32_1 = arith.constant 0 : i32
    return %2, %c0_i32_0 : i32, i32
  }
  func.func @transform_1(%arg0: i32, %arg1: i32) -> (i32, i32) {
    %c1_i32 = arith.constant 1 : i32
    %0 = arith.muli %arg0, %c1_i32 : i32
    %1 = arith.addi %0, %arg1 : i32
    %c0_i32 = arith.constant 0 : i32
    %2 = arith.minsi %1, %c0_i32 : i32
    %c0_i32_0 = arith.constant 0 : i32
    %c0_i32_1 = arith.constant 0 : i32
    return %2, %c0_i32_0 : i32, i32
  }
  func.func @transform_2(%arg0: i32, %arg1: i32) -> (i32, i32, i32) {
    %c0_i32 = arith.constant 0 : i32
    %c0_i32_0 = arith.constant 0 : i32
    %c0_i32_1 = arith.constant 0 : i32
    return %arg0, %c0_i32, %c0_i32_0 : i32, i32, i32
  }
}

</mosaic_0001>

<bundles_post_ra>
// kernel: tpu_custom_call.1
= control target key start
LH: loop header
LB: loop body
LE: loop exit
PB: predicated region body
PF: predicated region fallthrough
CT: control target
= control target key end

     0   :  { %7 = vsyncpa [#allocation3], 0  ;;  %s279_s0 = inlined_call_operand.hbm [shape: f32[16,128], index: 0, kind: input, shape index: {}]   ;;  %s280_s1 = inlined_call_operand.hbm [shape: f32[16,128], index: 1, kind: input, shape index: {}]   ;;  %s281_s2 = inlined_call_operand.hbm [shape: f32[1,8,128], index: 2, kind: output, shape index: {}]  }
   0x1   :  { %8 = vsyncpa [#allocation6], 0 }
   0x2   :  { %9 = vsyncpa [#allocation4], 0  ;;  %s223_s9 = smov [#allocation2]   ;;  %s151_s13 = scalar_lea.hbm %s279_s0, 256 }
   0x3   :  { %s21_s10 = sshll.u32 %s223_s9, 4  ;;  %p152_p0 = scmp.ne.s32.totalorder %s279_s0, %s151_s13  ;;  %s22_s10 = int_to_ptr.vmem [resolvable:$true] %s21_s10 }
   0x4   :  { %p155_p1 = scmp.lt.u32.totalorder %s151_s13, %s279_s0 }
   0x6   :  { %p157_p2 = pnand %p155_p1, %p152_p0 }
   0x8   :  { %160 = shalt.err (!%p157_p2)
}
   0x9   :  { %s161_s18 = scalar_lea.vmem %s22_s10, 256  ;;  %p166_p4 = scmp.lt.s32.totalorder %s22_s10, %s22_s10 }
   0xa   :  { %p162_p3 = scmp.ne.s32.totalorder %s22_s10, %s161_s18  ;;  %p167_p5 = scmp.lt.s32.totalorder %s161_s18, %s161_s18 }
   0xc   :  { %p168_p6 = por %p167_p5, %p166_p4 }
   0xe   :  { %p169_p7 = pnand %p168_p6, %p162_p3 }
  0x10   :  { %172 = shalt.err (!%p169_p7)
}
  0x11   :  { %s224_s19 = smov 128   ;;  %s225_s20 = smov 8  }
  0x12   :  { %27 = dma.hbm_to_vmem [thread:$0]  %s279_s0, 256, %s22_s10, [#allocation3], %s224_s19, %s224_s19, %s225_s20  }
  0x13   :  { %s226_s23 = smov [#allocation5]   ;;  %s173_s27 = scalar_lea.hbm %s280_s1, 256 }
  0x14   :  { %s39_s24 = sshll.u32 %s226_s23, 4  ;;  %p174_p8 = scmp.ne.s32.totalorder %s280_s1, %s173_s27  ;;  %s40_s24 = int_to_ptr.vmem [resolvable:$true] %s39_s24 }
  0x15   :  { %p177_p9 = scmp.lt.u32.totalorder %s173_s27, %s280_s1 }
  0x17   :  { %p179_p10 = pnand %p177_p9, %p174_p8 }
  0x19   :  { %182 = shalt.err (!%p179_p10)
}
  0x1a   :  { %s183_s4 = scalar_lea.vmem %s40_s24, 256  ;;  %p188_p12 = scmp.lt.s32.totalorder %s40_s24, %s40_s24 }
  0x1b   :  { %p184_p11 = scmp.ne.s32.totalorder %s40_s24, %s183_s4  ;;  %p189_p13 = scmp.lt.s32.totalorder %s183_s4, %s183_s4 }
  0x1d   :  { %p190_p0 = por %p189_p13, %p188_p12 }
  0x1f   :  { %p191_p1 = pnand %p190_p0, %p184_p11 }
  0x21   :  { %194 = shalt.err (!%p191_p1)
}
  0x22   :  { %45 = dma.hbm_to_vmem [thread:$0]  %s280_s1, 256, %s40_s24, [#allocation6], %s224_s19, %s224_s19, %s225_s20  }
  0x23   :  { %217 = dma.done.wait [#allocation3], 256  }
  0x24   :  { %218 = vsyncadd [#allocation3], 4294967040 }
  0x25   :  { %219 = dma.done.wait [#allocation6], 256  }
  0x26   :  { %220 = vsyncadd [#allocation6], 4294967040  ;;  %v65_v0 = vld [vmem:[#allocation2] sm:$0xff]  ;;  %v66_v1 = vld [vmem:[#allocation2 + $0x8] sm:$0xff]  ;;  %s227_s1 = smov [#allocation7]  }
  0x27   :  { %v71_v2 = vand.u32 2147483647, %v65_v0  ;;  %v72_v3 = vand.u32 2147483647, %v66_v1  ;;  %v69_v20 = vmax.f32 %v65_v0, 0.0  ;;  %v67_v23 = vld [vmem:[#allocation5] sm:$0xff] }
  0x28   :  { %v70_v24 = vmax.f32 %v66_v1, 0.0  ;;  %v68_v26 = vld [vmem:[#allocation5 + $0x8] sm:$0xff]  ;;  %v105_v31 = vsub.f32 1.0, %v67_v23  ;;  %s123_s6 = sshll.u32 %s227_s1, 4  ;;  %s124_s6 = int_to_ptr.vmem [resolvable:$true] %s123_s6 }
  0x29   :  { %v73_v4 = vsub.f32 0.0, %v71_v2  ;;  %v74_v5 = vsub.f32 0.0, %v72_v3  ;;  %v106_v33 = vsub.f32 1.0, %v68_v26  ;;  %s195_s7 = scalar_lea.vmem %s124_s6, 128  ;;  %p200_p3 = scmp.lt.s32.totalorder %s124_s6, %s124_s6 }
  0x2a   :  { %p196_p2 = scmp.ne.s32.totalorder %s124_s6, %s195_s7  ;;  %p201_p4 = scmp.lt.s32.totalorder %s195_s7, %s195_s7 }
  0x2b   :  { %v75_v6 = vmul.f32 1.442695, %v73_v4  ;;  %v77_v7 = vmul.f32 1.442695, %v74_v5 }
  0x2c   :  { %p202_p5 = por %p201_p4, %p200_p3 }
  0x2d   :  { %143 = vpow2.f32 %v75_v6 }
  0x2e   :  { %145 = vpow2.f32 %v77_v7  ;;  %p203_p6 = pnand %p202_p5, %p196_p2 }
  0x37   :  { %v144_v8 = vpop.eup %143 }
  0x38   :  { %v146_v9 = vpop.eup %145  ;;  %v79_v10 = vadd.f32 1.0, %v144_v8  ;;  %v82_v12 = vmul.f32 -0.5, %v144_v8  ;;  %v85_v15 = vand.u32 2147483647, %v144_v8 }
  0x39   :  { %v88_v11 = vadd.f32 1.0, %v146_v9  ;;  %v91_v13 = vmul.f32 -0.5, %v146_v9  ;;  %v94_v17 = vand.u32 2147483647, %v146_v9 }
  0x3a   :  { %147 = vlog2.f32 %v79_v10  ;;  %v83_v14 = vadd.f32 1.0, %v82_v12  ;;  %vm86_vm0 = vcmp.lt.f32.partialorder %v85_v15, 0.0004427343 }
  0x3b   :  { %149 = vlog2.f32 %v88_v11  ;;  %v92_v16 = vadd.f32 1.0, %v91_v13  ;;  %vm95_vm1 = vcmp.lt.f32.partialorder %v94_v17, 0.0004427343 }
  0x3c   :  { %v84_v18 = vmul.f32 %v144_v8, %v83_v14 }
  0x3d   :  { %v93_v21 = vmul.f32 %v146_v9, %v92_v16 }
  0x44   :  { %v148_v19 = vpop.eup %147 }
  0x45   :  { %v150_v22 = vpop.eup %149  ;;  %v81_v25 = vmul.f32 0.6931472, %v148_v19 }
  0x46   :  { %v90_v27 = vmul.f32 0.6931472, %v150_v22 }
  0x47   :  { %v87_v28 = vsel %vm86_vm0, %v84_v18, %v81_v25 }
  0x48   :  { %v96_v29 = vsel %vm95_vm1, %v93_v21, %v90_v27  ;;  %v97_v30 = vadd.f32 %v87_v28, %v69_v20 }
  0x49   :  { %v98_v32 = vadd.f32 %v96_v29, %v70_v24 }
  0x4a   :  { %v99_v34 = vsub.f32 %v97_v30, %v65_v0  ;;  %v107_v35 = vmin.f32 %v97_v30, 100.0 }
  0x4b   :  { %v100_v36 = vsub.f32 %v98_v32, %v66_v1  ;;  %v108_v37 = vmin.f32 %v98_v32, 100.0 }
  0x4c   :  { %v101_v38 = vmin.f32 %v99_v34, 100.0  ;;  %v109_v39 = vmul.f32 %v107_v35, %v105_v31 }
  0x4d   :  { %v102_v40 = vmin.f32 %v100_v36, 100.0  ;;  %v110_v41 = vmul.f32 %v108_v37, %v106_v33 }
  0x4e   :  { %v103_v42 = vmul.f32 %v101_v38, %v67_v23 }
  0x4f   :  { %v104_v43 = vmul.f32 %v102_v40, %v68_v26 }
  0x50   :  { %v111_v44 = vadd.f32 %v109_v39, %v103_v42 }
  0x51   :  { %v112_v45 = vadd.f32 %v110_v41, %v104_v43 }
  0x53   :  { %v114_v46 = vadd.f32 %v112_v45, %v111_v44 }
  0x55   :  { %116 = vst [vmem:[#allocation7] sm:$0xff] %v114_v46 }
  0x56   :  { %206 = shalt.err (!%p203_p6)
}
  0x57   :  { %s207_s10 = scalar_lea.hbm %s281_s2, 128 }
  0x58   :  { %p208_p7 = scmp.ne.s32.totalorder %s281_s2, %s207_s10  ;;  %p211_p8 = scmp.lt.u32.totalorder %s207_s10, %s281_s2 }
  0x5a   :  { %p213_p9 = pnand %p211_p8, %p208_p7 }
  0x5c   :  { %216 = shalt.err (!%p213_p9)
}
  0x5d   :  { %126 = dma.vmem_to_hbm [thread:$0]  %s124_s6, 128, %s281_s2, [#allocation4]  }
  0x5e   :  { %221 = dma.done.wait [#allocation4], 128  }
  0x5f   :  { %222 = vsyncadd [#allocation4], 4294967168 }
  0x60   :  { %130 = vsyncpa [#allocation3], 1 }
  0x61   :  { %131 = vsyncpa [#allocation6], 1 }
  0x62   :  { %132 = vsyncpa [#allocation4], 1 }

</bundles_post_ra>
